<compile_context>
chip_gen: v5e
topology: v5e:2x2
jax: 0.10.0
libtpu: 0.0.40
codegen_flags: <defaults>
</compile_context>

<pallas_src>
import math

import jax
import jax.numpy as jnp
from jax.experimental import pallas as pl
from jax.experimental.pallas import tpu as pltpu

N_UNITS = 20        # hidden units per sub-network (createNet default)
HPAD = 64           # padded fused hidden width (3*20 -> 64)
NHEAD = 8           # padded fused head width: [logit0, logit1, mu_pre, baseline, pad*4]


def halting_policy_kernel(scalars_ref, x_ref, aux_ref,
                          w1_ref, b1_ref, w2_ref, b2_ref,
                          outf_ref, outi_ref):
    t = scalars_ref[0]
    eps = scalars_ref[1]
    tmax = scalars_ref[2]
    std = scalars_ref[3]
    log_norm = scalars_ref[4]          # log(std) + 0.5*log(2*pi)

    x = x_ref[...]                     # (TB, ninp)
    aux = aux_ref[...]                 # (TB, 4)
    checkvec = aux[:, 0:1]
    halt_points = aux[:, 1:2]
    u_stop = aux[:, 2:3]
    z_hop = aux[:, 3:4]

    # ---------------- fused MLPs (2 MXU matmuls for all 3 networks) ----------
    h = jnp.tanh(jnp.dot(x, w1_ref[...], preferred_element_type=jnp.float32)
                 + b1_ref[...])                                        # (TB, 64)
    heads = jnp.dot(h, w2_ref[...], preferred_element_type=jnp.float32) \
        + b2_ref[...]                                                  # (TB, 8)

    l0 = heads[:, 0:1]
    l1 = heads[:, 1:2]
    mu_pre = heads[:, 2:3]
    baseline = heads[:, 3:4]

    # ---------------- stopPolicy (exact 2-class softmax via logit diff) ------
    d = l0 - l1
    p0s = 0.5 * (jnp.tanh(0.5 * d) + 1.0)             # sigmoid(d) = softmax p0
    # wait_probs = -log(p0s) = softplus(-d), numerically stable form
    wait_probs = jnp.maximum(-d, 0.0) + jnp.log(1.0 + jnp.exp(-jnp.abs(d)))
    # epsilon-greedy mix exactly as torch: (1-eps)*probs + eps*0.05 (unnormalized)
    p0m = (1.0 - eps) * p0s + 0.05 * eps
    p1m = (1.0 - eps) * (1.0 - p0s) + 0.05 * eps
    p0n = p0m / (p0m + p1m)                           # multinomial normalizes the row
    action = (u_stop >= p0n).astype(jnp.int32)        # 0 = Stop, 1 = Hop
    log_pi_stop = jnp.where(action == 0, jnp.log(p0m), jnp.log(p1m))

    # ---------------- hopPolicy ----------------------------------------------
    mu = jnp.tanh(mu_pre)
    l_t = mu + std * z_hop                            # Normal(mu, std).rsample()
    log_pi_hop = -0.5 * z_hop * z_hop - log_norm      # (l_t - mu)/std == z exactly
    l_t = jnp.abs(jnp.clip(l_t, -1.0, 1.0))
    hop_size = (tmax * l_t).astype(jnp.int32)         # (tmax * hop).long()

    # ---------------- bookkeeping --------------------------------------------
    v = (checkvec == t).astype(jnp.int32)             # allowable actions
    stop = v * (action == 0).astype(jnp.int32)
    grad_mask = jnp.where(halt_points > 0.0,
                          jnp.zeros_like(halt_points), jnp.ones_like(halt_points))
    new_checkvec = jnp.where(checkvec == t,
                             t + hop_size.astype(jnp.float32), checkvec)

    zf = jnp.zeros_like(baseline)
    outf_ref[...] = jnp.concatenate(
        [log_pi_stop, wait_probs, log_pi_hop, baseline, grad_mask, new_checkvec, zf, zf],
        axis=1)
    zi = jnp.zeros_like(action)
    outi_ref[...] = jnp.concatenate(
        [stop, action, hop_size, v, zi, zi, zi, zi], axis=1)


def _round_up(a, m):
    return ((a + m - 1) // m) * m


def halting_policy_forward(packed_params, x, t, checkvec, halt_points, u_stop, z_hop,
                           *, eps, tmax, std):
    """One call of HaltingPolicy.forward.  Returns all quantities the torch
    module computes (return value `stop` plus everything it logs / mutates)."""
    w1, b1, w2, b2 = packed_params
    B, ninp = x.shape

    # pack per-sample vectors into one (B, 4) slab: checkvec, halt_points, u, z
    aux = jnp.concatenate(
        [checkvec.reshape(B, 1), halt_points.reshape(B, 1),
         u_stop.reshape(B, 1), z_hop.reshape(B, 1)], axis=1).astype(jnp.float32)

    # batch tile (multiple of 8); pad batch so the grid divides evenly
    TB = min(512, _round_up(B, 8))
    Bp = _round_up(B, TB)
    if Bp != B:
        x = jnp.pad(x, ((0, Bp - B), (0, 0)))
        aux = jnp.pad(aux, ((0, Bp - B), (0, 0)))

    scalars = jnp.array(
        [t, eps, tmax, std, math.log(std) + 0.5 * math.log(2.0 * math.pi)],
        dtype=jnp.float32)

    grid = (Bp // TB,)
    smem = pl.BlockSpec(memory_space=pltpu.MemorySpace.SMEM)

    in_specs = [
        smem,                                                   # scalars
        pl.BlockSpec((TB, ninp), lambda i: (i, 0)),             # x
        pl.BlockSpec((TB, 4), lambda i: (i, 0)),                # aux
        pl.BlockSpec((ninp, HPAD), lambda i: (0, 0)),           # W1 (resident)
        pl.BlockSpec((1, HPAD), lambda i: (0, 0)),              # B1
        pl.BlockSpec((HPAD, NHEAD), lambda i: (0, 0)),          # W2
        pl.BlockSpec((1, NHEAD), lambda i: (0, 0)),             # B2
    ]
    out_specs = (
        pl.BlockSpec((TB, NHEAD), lambda i: (i, 0)),            # f32 slab
        pl.BlockSpec((TB, NHEAD), lambda i: (i, 0)),            # i32 slab
    )
    out_shape = (
        jax.ShapeDtypeStruct((Bp, NHEAD), jnp.float32),
        jax.ShapeDtypeStruct((Bp, NHEAD), jnp.int32),
    )

    flops = 2 * Bp * (ninp * HPAD + HPAD * NHEAD)
    bytes_accessed = 4 * (Bp * ninp + Bp * 4 + ninp * HPAD + HPAD * NHEAD
                          + 2 * Bp * NHEAD + HPAD + NHEAD)
    cost = pl.CostEstimate(flops=flops,
                           transcendentals=Bp * (HPAD + 8),
                           bytes_accessed=bytes_accessed)

    outf, outi = pl.pallas_call(
        halting_policy_kernel,
        out_shape=out_shape,
        grid=grid,
        in_specs=in_specs,
        out_specs=out_specs,
        compiler_params=pltpu.CompilerParams(
            dimension_semantics=("parallel",)),
        cost_estimate=cost,
    )(scalars, x, aux, w1, b1, w2, b2)

    outf = outf[:B]
    outi = outi[:B]

    return {
        "stop": outi[:, 0:1],               # (B, 1) int — forward() return value
        "action": outi[:, 1],               # (B,)
        "log_pi_stop": outf[:, 0],          # (B,)
        "wait_probs": outf[:, 1],           # (B,)
        "hop_size": outi[:, 2:3],           # (B, 1) int
        "log_pi_hop": outf[:, 2:3],         # (B, 1)
        "baseline": outf[:, 3],             # (B,)  BaselineNetwork(x).squeeze()
        "grad_mask": outf[:, 4],            # (B,)
        "checkvec": outf[:, 5:6],           # (B, 1) — updated self.checkvec
        "allowable_actions": outi[:, 3:4],  # (B, 1)
    }


# ----------------------------- parameter helpers -----------------------------

def _linear_init(key, fan_in, fan_out):
    kw, kb = jax.random.split(key)
    bound = 1.0 / math.sqrt(fan_in)
    w = jax.random.uniform(kw, (fan_in, fan_out), jnp.float32, -bound, bound)
    b = jax.random.uniform(kb, (1, fan_out), jnp.float32, -bound, bound)
    return w, b


def init_params(key, ninp, n_units=N_UNITS):
    ks = jax.random.split(key, 6)
    w1s, b1s = _linear_init(ks[0], ninp, n_units)   # stopNet layer 1
    w2s, b2s = _linear_init(ks[1], n_units, 2)      # stopNet layer 2 (2 logits)
    w1h, b1h = _linear_init(ks[2], ninp, n_units)   # hopNet layer 1
    w2h, b2h = _linear_init(ks[3], n_units, 1)      # hopNet layer 2
    w1b, b1b = _linear_init(ks[4], ninp, n_units)   # BaselineNetwork layer 1
    w2b, b2b = _linear_init(ks[5], n_units, 1)      # BaselineNetwork layer 2
    return (w1s, b1s, w2s, b2s, w1h, b1h, w2h, b2h, w1b, b1b, w2b, b2b)


def pack_params(raw_params, ninp, n_units=N_UNITS):
    """Concatenate / block-diagonalize the 3 MLPs into the fused layout ONCE
    (done at init, not per forward call)."""
    (w1s, b1s, w2s, b2s, w1h, b1h, w2h, b2h, w1b, b1b, w2b, b2b) = raw_params
    w1 = jnp.zeros((ninp, HPAD), jnp.float32)
    w1 = w1.at[:, 0:n_units].set(w1s)
    w1 = w1.at[:, n_units:2 * n_units].set(w1h)
    w1 = w1.at[:, 2 * n_units:3 * n_units].set(w1b)
    b1 = jnp.zeros((1, HPAD), jnp.float32)
    b1 = b1.at[:, 0:n_units].set(b1s)
    b1 = b1.at[:, n_units:2 * n_units].set(b1h)
    b1 = b1.at[:, 2 * n_units:3 * n_units].set(b1b)
    w2 = jnp.zeros((HPAD, NHEAD), jnp.float32)
    w2 = w2.at[0:n_units, 0:2].set(w2s)
    w2 = w2.at[n_units:2 * n_units, 2:3].set(w2h)
    w2 = w2.at[2 * n_units:3 * n_units, 3:4].set(w2b)
    b2 = jnp.zeros((1, NHEAD), jnp.float32)
    b2 = b2.at[:, 0:2].set(b2s)
    b2 = b2.at[:, 2:3].set(b2h)
    b2 = b2.at[:, 3:4].set(b2b)
    return w1, b1, w2, b2


if __name__ == "__main__":
    B, ninp = 8, 32
    tmax = 16.0
    std = 0.1
    eps = 0.5          # self._eps (epsilon-greedy schedule value for this epoch)
    t = 1.0            # current timestep

    key = jax.random.PRNGKey(0)
    k_x, k_u, k_z, k_p = jax.random.split(key, 4)

    x = jax.random.normal(k_x, (B, ninp), jnp.float32)          # prefix embedding
    checkvec = jnp.ones((B, 1), jnp.float32)                    # self.checkvec at init
    halt_points = -jnp.ones((B,), jnp.float32)                  # nothing halted yet
    u_stop = jax.random.uniform(k_u, (B, 1), jnp.float32)       # multinomial noise
    z_hop = jax.random.normal(k_z, (B, 1), jnp.float32)         # Normal.rsample noise

    raw_params = init_params(k_p, ninp)
    packed_params = pack_params(raw_params, ninp)               # done once at init

    out = halting_policy_forward(packed_params, x, t, checkvec, halt_points,
                                 u_stop, z_hop, eps=eps, tmax=tmax, std=std)
    jax.block_until_ready(out)
    print("KERNEL_OK")
</pallas_src>

<mosaic_0001>
module attributes {stable_mosaic.version = 11 : i64} {
  func.func @halting_policy_kernel(%arg0: i32, %arg1: memref<5xf32, #tpu.memory_space<smem>>, %arg2: memref<8x32xf32, #tpu.memory_space<vmem>>, %arg3: memref<8x4xf32, #tpu.memory_space<vmem>>, %arg4: memref<32x64xf32, #tpu.memory_space<vmem>>, %arg5: memref<1x64xf32, #tpu.memory_space<vmem>>, %arg6: memref<64x8xf32, #tpu.memory_space<vmem>>, %arg7: memref<1x8xf32, #tpu.memory_space<vmem>>, %arg8: memref<8x8xf32, #tpu.memory_space<vmem>>, %arg9: memref<8x8xi32, #tpu.memory_space<vmem>>) attributes {dimension_semantics = [#tpu.dimension_semantics<parallel>], iteration_bounds = array<i64: 1>, scalar_prefetch = 0 : i64, scratch_operands = 0 : i64, tpu.core_type = #tpu.core_type<tc>, window_params = [{transform_indices = @transform_0, window_bounds = array<i64: 5>}, {transform_indices = @transform_1, window_bounds = array<i64: 8, 32>}, {transform_indices = @transform_2, window_bounds = array<i64: 8, 4>}, {pipeline_mode = #tpu.pipeline_mode<synchronous>, transform_indices = @transform_3, window_bounds = array<i64: 32, 64>}, {pipeline_mode = #tpu.pipeline_mode<synchronous>, transform_indices = @transform_4, window_bounds = array<i64: 1, 64>}, {pipeline_mode = #tpu.pipeline_mode<synchronous>, transform_indices = @transform_5, window_bounds = array<i64: 64, 8>}, {pipeline_mode = #tpu.pipeline_mode<synchronous>, transform_indices = @transform_6, window_bounds = array<i64: 1, 8>}, {transform_indices = @transform_7, window_bounds = array<i64: 8, 8>}, {transform_indices = @transform_8, window_bounds = array<i64: 8, 8>}]} {
    %c0 = arith.constant 0 : index
    %0 = memref.load %arg1[%c0] : memref<5xf32, #tpu.memory_space<smem>>
    %c1 = arith.constant 1 : index
    %1 = memref.load %arg1[%c1] : memref<5xf32, #tpu.memory_space<smem>>
    %c2 = arith.constant 2 : index
    %2 = memref.load %arg1[%c2] : memref<5xf32, #tpu.memory_space<smem>>
    %c3 = arith.constant 3 : index
    %3 = memref.load %arg1[%c3] : memref<5xf32, #tpu.memory_space<smem>>
    %c4 = arith.constant 4 : index
    %4 = memref.load %arg1[%c4] : memref<5xf32, #tpu.memory_space<smem>>
    %c0_0 = arith.constant 0 : index
    %c0_1 = arith.constant 0 : index
    %5 = vector.load %arg2[%c0_0, %c0_1] : memref<8x32xf32, #tpu.memory_space<vmem>>, vector<8x32xf32>
    %c0_2 = arith.constant 0 : index
    %c0_3 = arith.constant 0 : index
    %6 = vector.load %arg3[%c0_2, %c0_3] : memref<8x4xf32, #tpu.memory_space<vmem>>, vector<8x4xf32>
    %7 = vector.extract_strided_slice %6 {offsets = [0, 0], sizes = [8, 1], strides = [1, 1]} : vector<8x4xf32> to vector<8x1xf32>
    %8 = vector.extract_strided_slice %6 {offsets = [0, 1], sizes = [8, 1], strides = [1, 1]} : vector<8x4xf32> to vector<8x1xf32>
    %9 = vector.extract_strided_slice %6 {offsets = [0, 2], sizes = [8, 1], strides = [1, 1]} : vector<8x4xf32> to vector<8x1xf32>
    %10 = vector.extract_strided_slice %6 {offsets = [0, 3], sizes = [8, 1], strides = [1, 1]} : vector<8x4xf32> to vector<8x1xf32>
    %c0_4 = arith.constant 0 : index
    %c0_5 = arith.constant 0 : index
    %11 = vector.load %arg4[%c0_4, %c0_5] : memref<32x64xf32, #tpu.memory_space<vmem>>, vector<32x64xf32>
    %cst = arith.constant dense<0.000000e+00> : vector<8x64xf32>
    %12 = tpu.matmul %5, %11, %cst {dimension_numbers = #tpu.dot_dimension_numbers<[1], [0], [0], [1], [0, 0, 1, 1], [], []>} : vector<8x32xf32>, vector<32x64xf32>, vector<8x64xf32> -> vector<8x64xf32>
    %c0_6 = arith.constant 0 : index
    %c0_7 = arith.constant 0 : index
    %13 = vector.load %arg5[%c0_6, %c0_7] : memref<1x64xf32, #tpu.memory_space<vmem>>, vector<1x64xf32>
    %14 = vector.broadcast %13 : vector<1x64xf32> to vector<8x64xf32>
    %15 = arith.addf %12, %14 : vector<8x64xf32>
    %16 = math.tanh %15 : vector<8x64xf32>
    %c0_8 = arith.constant 0 : index
    %c0_9 = arith.constant 0 : index
    %17 = vector.load %arg6[%c0_8, %c0_9] : memref<64x8xf32, #tpu.memory_space<vmem>>, vector<64x8xf32>
    %cst_10 = arith.constant dense<0.000000e+00> : vector<8x8xf32>
    %18 = tpu.matmul %16, %17, %cst_10 {dimension_numbers = #tpu.dot_dimension_numbers<[1], [0], [0], [1], [0, 0, 1, 1], [], []>} : vector<8x64xf32>, vector<64x8xf32>, vector<8x8xf32> -> vector<8x8xf32>
    %c0_11 = arith.constant 0 : index
    %c0_12 = arith.constant 0 : index
    %19 = vector.load %arg7[%c0_11, %c0_12] : memref<1x8xf32, #tpu.memory_space<vmem>>, vector<1x8xf32>
    %20 = vector.broadcast %19 : vector<1x8xf32> to vector<8x8xf32>
    %21 = arith.addf %18, %20 : vector<8x8xf32>
    %22 = vector.extract_strided_slice %21 {offsets = [0, 0], sizes = [8, 1], strides = [1, 1]} : vector<8x8xf32> to vector<8x1xf32>
    %23 = vector.extract_strided_slice %21 {offsets = [0, 1], sizes = [8, 1], strides = [1, 1]} : vector<8x8xf32> to vector<8x1xf32>
    %24 = vector.extract_strided_slice %21 {offsets = [0, 2], sizes = [8, 1], strides = [1, 1]} : vector<8x8xf32> to vector<8x1xf32>
    %25 = vector.extract_strided_slice %21 {offsets = [0, 3], sizes = [8, 1], strides = [1, 1]} : vector<8x8xf32> to vector<8x1xf32>
    %26 = arith.subf %22, %23 : vector<8x1xf32>
    %cst_13 = arith.constant 5.000000e-01 : f32
    %27 = vector.broadcast %cst_13 : f32 to vector<8x1xf32>
    %28 = arith.mulf %27, %26 : vector<8x1xf32>
    %29 = math.tanh %28 : vector<8x1xf32>
    %cst_14 = arith.constant 1.000000e+00 : f32
    %30 = vector.broadcast %cst_14 : f32 to vector<8x1xf32>
    %31 = arith.addf %29, %30 : vector<8x1xf32>
    %cst_15 = arith.constant 5.000000e-01 : f32
    %32 = vector.broadcast %cst_15 : f32 to vector<8x1xf32>
    %33 = arith.mulf %32, %31 : vector<8x1xf32>
    %cst_16 = arith.constant 0.000000e+00 : f32
    %34 = vector.broadcast %cst_16 : f32 to vector<8x1xf32>
    %35 = arith.subf %34, %26 : vector<8x1xf32>
    %cst_17 = arith.constant 0.000000e+00 : f32
    %36 = vector.broadcast %cst_17 : f32 to vector<8x1xf32>
    %37 = arith.maximumf %35, %36 : vector<8x1xf32>
    %38 = math.absf %26 : vector<8x1xf32>
    %cst_18 = arith.constant 0.000000e+00 : f32
    %39 = vector.broadcast %cst_18 : f32 to vector<8x1xf32>
    %40 = arith.subf %39, %38 : vector<8x1xf32>
    %41 = math.exp %40 : vector<8x1xf32>
    %cst_19 = arith.constant 1.000000e+00 : f32
    %42 = vector.broadcast %cst_19 : f32 to vector<8x1xf32>
    %43 = arith.addf %42, %41 : vector<8x1xf32>
    %44 = math.log %43 : vector<8x1xf32>
    %45 = arith.addf %37, %44 : vector<8x1xf32>
    %cst_20 = arith.constant 1.000000e+00 : f32
    %46 = arith.subf %cst_20, %1 : f32
    %47 = vector.broadcast %46 : f32 to vector<8x1xf32>
    %48 = arith.mulf %47, %33 : vector<8x1xf32>
    %cst_21 = arith.constant 5.000000e-02 : f32
    %49 = arith.mulf %cst_21, %1 : f32
    %50 = vector.broadcast %49 : f32 to vector<8x1xf32>
    %51 = arith.addf %48, %50 : vector<8x1xf32>
    %cst_22 = arith.constant 1.000000e+00 : f32
    %52 = arith.subf %cst_22, %1 : f32
    %cst_23 = arith.constant 1.000000e+00 : f32
    %53 = vector.broadcast %cst_23 : f32 to vector<8x1xf32>
    %54 = arith.subf %53, %33 : vector<8x1xf32>
    %55 = vector.broadcast %52 : f32 to vector<8x1xf32>
    %56 = arith.mulf %55, %54 : vector<8x1xf32>
    %cst_24 = arith.constant 5.000000e-02 : f32
    %57 = arith.mulf %cst_24, %1 : f32
    %58 = vector.broadcast %57 : f32 to vector<8x1xf32>
    %59 = arith.addf %56, %58 : vector<8x1xf32>
    %60 = arith.addf %51, %59 : vector<8x1xf32>
    %61 = arith.divf %51, %60 : vector<8x1xf32>
    %62 = arith.cmpf oge, %9, %61 : vector<8x1xf32>
    %63 = arith.extui %62 : vector<8x1xi1> to vector<8x1xi32>
    %c0_i32 = arith.constant 0 : i32
    %64 = vector.broadcast %c0_i32 : i32 to vector<8x1xi32>
    %65 = arith.cmpi eq, %63, %64 : vector<8x1xi32>
    %66 = math.log %51 : vector<8x1xf32>
    %67 = math.log %59 : vector<8x1xf32>
    %68 = arith.select %65, %66, %67 : vector<8x1xi1>, vector<8x1xf32>
    %69 = math.tanh %24 : vector<8x1xf32>
    %70 = vector.broadcast %3 : f32 to vector<8x1xf32>
    %71 = arith.mulf %70, %10 : vector<8x1xf32>
    %72 = arith.addf %69, %71 : vector<8x1xf32>
    %cst_25 = arith.constant -5.000000e-01 : f32
    %73 = vector.broadcast %cst_25 : f32 to vector<8x1xf32>
    %74 = arith.mulf %73, %10 : vector<8x1xf32>
    %75 = arith.mulf %74, %10 : vector<8x1xf32>
    %76 = vector.broadcast %4 : f32 to vector<8x1xf32>
    %77 = arith.subf %75, %76 : vector<8x1xf32>
    %cst_26 = arith.constant -1.000000e+00 : f32
    %cst_27 = arith.constant 1.000000e+00 : f32
    %78 = vector.broadcast %cst_26 : f32 to vector<8x1xf32>
    %79 = arith.maximumf %78, %72 : vector<8x1xf32>
    %80 = vector.broadcast %cst_27 : f32 to vector<8x1xf32>
    %81 = arith.minimumf %80, %79 : vector<8x1xf32>
    %82 = math.absf %81 : vector<8x1xf32>
    %83 = vector.broadcast %2 : f32 to vector<8x1xf32>
    %84 = arith.mulf %83, %82 : vector<8x1xf32>
    %85 = arith.fptosi %84 : vector<8x1xf32> to vector<8x1xi32>
    %86 = vector.broadcast %0 : f32 to vector<8x1xf32>
    %87 = arith.cmpf oeq, %7, %86 : vector<8x1xf32>
    %88 = arith.extui %87 : vector<8x1xi1> to vector<8x1xi32>
    %c0_i32_28 = arith.constant 0 : i32
    %89 = vector.broadcast %c0_i32_28 : i32 to vector<8x1xi32>
    %90 = arith.cmpi eq, %63, %89 : vector<8x1xi32>
    %91 = arith.extui %90 : vector<8x1xi1> to vector<8x1xi32>
    %92 = arith.muli %88, %91 : vector<8x1xi32>
    %cst_29 = arith.constant 0.000000e+00 : f32
    %93 = vector.broadcast %cst_29 : f32 to vector<8x1xf32>
    %94 = arith.cmpf ogt, %8, %93 : vector<8x1xf32>
    %cst_30 = arith.constant 0.000000e+00 : f32
    %95 = vector.broadcast %cst_30 : f32 to vector<8x1xf32>
    %cst_31 = arith.constant 1.000000e+00 : f32
    %96 = vector.broadcast %cst_31 : f32 to vector<8x1xf32>
    %97 = arith.select %94, %95, %96 : vector<8x1xi1>, vector<8x1xf32>
    %98 = vector.broadcast %0 : f32 to vector<8x1xf32>
    %99 = arith.cmpf oeq, %7, %98 : vector<8x1xf32>
    %100 = arith.sitofp %85 : vector<8x1xi32> to vector<8x1xf32>
    %101 = vector.broadcast %0 : f32 to vector<8x1xf32>
    %102 = arith.addf %101, %100 : vector<8x1xf32>
    %103 = arith.select %99, %102, %7 : vector<8x1xi1>, vector<8x1xf32>
    %cst_32 = arith.constant 0.000000e+00 : f32
    %104 = vector.broadcast %cst_32 : f32 to vector<8x1xf32>
    %105 = tpu.concatenate %68, %45, %77, %25, %97, %103, %104, %104 in 1 : vector<8x1xf32>, vector<8x1xf32>, vector<8x1xf32>, vector<8x1xf32>, vector<8x1xf32>, vector<8x1xf32>, vector<8x1xf32>, vector<8x1xf32> -> vector<8x8xf32>
    %c0_33 = arith.constant 0 : index
    %c0_34 = arith.constant 0 : index
    %106 = vector.load %arg8[%c0_33, %c0_34] : memref<8x8xf32, #tpu.memory_space<vmem>>, vector<8x8xf32>
    tpu.vector_store %arg8[%c0_33, %c0_34], %105 {strides = array<i32>} : memref<8x8xf32, #tpu.memory_space<vmem>>, vector<8x8xf32>,
    %c0_i32_35 = arith.constant 0 : i32
    %107 = vector.broadcast %c0_i32_35 : i32 to vector<8x1xi32>
    %108 = tpu.concatenate %92, %63, %85, %88, %107, %107, %107, %107 in 1 : vector<8x1xi32>, vector<8x1xi32>, vector<8x1xi32>, vector<8x1xi32>, vector<8x1xi32>, vector<8x1xi32>, vector<8x1xi32>, vector<8x1xi32> -> vector<8x8xi32>
    %c0_36 = arith.constant 0 : index
    %c0_37 = arith.constant 0 : index
    %109 = vector.load %arg9[%c0_36, %c0_37] : memref<8x8xi32, #tpu.memory_space<vmem>>, vector<8x8xi32>
    tpu.vector_store %arg9[%c0_36, %c0_37], %108 {strides = array<i32>} : memref<8x8xi32, #tpu.memory_space<vmem>>, vector<8x8xi32>,
    return
  }
  func.func @transform_0(%arg0: i32) -> i32 {
    %c0_i32 = arith.constant 0 : i32
    %c0_i32_0 = arith.constant 0 : i32
    return %c0_i32 : i32
  }
  func.func @transform_1(%arg0: i32) -> (i32, i32) {
    %c0_i32 = arith.constant 0 : i32
    %c0_i32_0 = arith.constant 0 : i32
    return %arg0, %c0_i32 : i32, i32
  }
  func.func @transform_2(%arg0: i32) -> (i32, i32) {
    %c0_i32 = arith.constant 0 : i32
    %c0_i32_0 = arith.constant 0 : i32
    return %arg0, %c0_i32 : i32, i32
  }
  func.func @transform_3(%arg0: i32) -> (i32, i32) {
    %c0_i32 = arith.constant 0 : i32
    %c0_i32_0 = arith.constant 0 : i32
    %c0_i32_1 = arith.constant 0 : i32
    return %c0_i32, %c0_i32_0 : i32, i32
  }
  func.func @transform_4(%arg0: i32) -> (i32, i32) {
    %c0_i32 = arith.constant 0 : i32
    %c0_i32_0 = arith.constant 0 : i32
    %c0_i32_1 = arith.constant 0 : i32
    return %c0_i32, %c0_i32_0 : i32, i32
  }
  func.func @transform_5(%arg0: i32) -> (i32, i32) {
    %c0_i32 = arith.constant 0 : i32
    %c0_i32_0 = arith.constant 0 : i32
    %c0_i32_1 = arith.constant 0 : i32
    return %c0_i32, %c0_i32_0 : i32, i32
  }
  func.func @transform_6(%arg0: i32) -> (i32, i32) {
    %c0_i32 = arith.constant 0 : i32
    %c0_i32_0 = arith.constant 0 : i32
    %c0_i32_1 = arith.constant 0 : i32
    return %c0_i32, %c0_i32_0 : i32, i32
  }
  func.func @transform_7(%arg0: i32) -> (i32, i32) {
    %c0_i32 = arith.constant 0 : i32
    %c0_i32_0 = arith.constant 0 : i32
    return %arg0, %c0_i32 : i32, i32
  }
  func.func @transform_8(%arg0: i32) -> (i32, i32) {
    %c0_i32 = arith.constant 0 : i32
    %c0_i32_0 = arith.constant 0 : i32
    return %arg0, %c0_i32 : i32, i32
  }
}

</mosaic_0001>

<bundles_post_ra>
// kernel: tpu_custom_call.1
= control target key start
LH: loop header
LB: loop body
LE: loop exit
PB: predicated region body
PF: predicated region fallthrough
CT: control target
= control target key end

     0   :  { %14 = vsyncpa [#allocation4], 0  ;;  %s579_s0 = inlined_call_operand.vmem [shape: f32[5], index: 0, kind: input, shape index: {}]   ;;  %s580_s1 = inlined_call_operand.vmem [shape: f32[8,32], index: 1, kind: input, shape index: {}]   ;;  %s581_s2 = inlined_call_operand.vmem [shape: f32[8,4], index: 2, kind: input, shape index: {}]   ;;  %s582_s3 = inlined_call_operand.vmem [shape: f32[32,64], index: 3, kind: input, shape index: {}]   ;;  %s583_s4 = inlined_call_operand.vmem [shape: f32[1,64], index: 4, kind: input, shape index: {}]   ;;  %s584_s5 = inlined_call_operand.vmem [shape: f32[64,8], index: 5, kind: input, shape index: {}]   ;;  %s585_s6 = inlined_call_operand.vmem [shape: f32[1,8], index: 6, kind: input, shape index: {}]   ;;  %s586_s7 = inlined_call_operand.hbm [shape: f32[8,8], index: 7, kind: output, shape index: {0}]   ;;  %s587_s8 = inlined_call_operand.hbm [shape: s32[8,8], index: 8, kind: output, shape index: {1}]  }
   0x1   :  { %15 = vsyncpa [#allocation3], 0 }
   0x2   :  { %16 = vsyncpa [#allocation7], 0  ;;  %s22_s29 = sshll.u32 %s579_s0, 4  ;;  %s406_s30 = smov [#allocation2]   ;;  %s23_s29 = int_to_ptr.vmem [resolvable:$true] %s22_s29 }
   0x3   :  { %25 = dma.vmem_to_smem %s23_s29, 16, %s406_s30, [#allocation4]  }
   0x4   :  { %400 = dma.done.wait [#allocation4], 16  }
   0x5   :  { %401 = vsyncadd [#allocation4], 4294967280 }
   0x6   :  { %42 = sfence }
   0x7   :  { %v53_v0 = vld [vmem:[%s582_s3 + $0x18] sm:$0xff]  ;;  %v52_v1 = vld [vmem:[%s582_s3 + $0x10] sm:$0xff]  ;;  %v51_v3 = vld [vmem:[%s582_s3 + $0x8] sm:$0xff]  ;;  %vm58_vm0 = vcmask 261120   ;;  %vm95_vm1 = vcmask 523264   ;;  %s300_s12 = sld [smem:[#allocation2 + $0x3]] }
   0x8   :  { %74 = vmatpush.msra.mxu0 %v53_v0  ;;  %v90_v2 = vld [vmem:[%s584_s5 + $0x38] sm:$0xff]  ;;  %v89_v4 = vld [vmem:[%s584_s5 + $0x30] sm:$0xff]  ;;  %v88_v5 = vld [vmem:[%s584_s5 + $0x28] sm:$0xff]  ;;  %s299_s15 = sld [smem:[#allocation2 + $0x2]]  ;;  %s408_s18 = smov 2   ;;  %vm237_vm11 = vcmask 7168  }
   0x9   :  { %107 = vmatpush.msra.mxu1 %v90_v2  ;;  %v50_v6 = vld [vmem:[%s582_s3] sm:$0xff]  ;;  %v86_v9 = vld [vmem:[%s584_s5 + $0x18] sm:$0xff]  ;;  %v85_v10 = vld [vmem:[%s584_s5 + $0x10] sm:$0xff]  ;;  %s527_s17 = sld [smem:[#allocation2]]  ;;  %s409_s19 = smov 126   ;;  %vm239_vm12 = vcmask 15360  }
   0xa   :  { %75 = vmatpush.msra.mxu0 %v52_v1  ;;  %v48_v7 = vld [vmem:[%s580_s1] sm:$0xff]  ;;  %v84_v11 = vld [vmem:[%s584_s5 + $0x8] sm:$0xff]  ;;  %s410_s20 = smov 1   ;;  %s301_s21 = sld [smem:[#allocation2 + $0x4]]  ;;  %vm243_vm13 = vcmask 31744   ;;  %vm241_vm14 = vcmask 23552  }
   0xb   :  { %108 = vmatpush.msra.mxu1 %v89_v4  ;;  %v87_v8 = vld [vmem:[%s584_s5 + $0x20] sm:$0xff]  ;;  %s412_s22 = smov 3   ;;  %s414_s23 = smov 5   ;;  %vm245_vm15 = vcmask 39936  }
   0xc   :  { %76 = vmatpush.msra.mxu0 %v51_v3  ;;  %v83_v12 = vld [vmem:[%s584_s5] sm:$0xff]  ;;  %s407_s5 = smov 127   ;;  %s415_s24 = smov [#allocation6]  }
   0xd   :  { %109 = vmatpush.msra.mxu1 %v88_v5  ;;  %v322_v13 = vld [vmem:[%s583_s4] ss:$0 sm:$0xff]  ;;  %v184_v21 = vstv %s300_s12  ;;  %s281_s25 = sshll.u32 %s415_s24, 4  ;;  %s283_s3 = sshll.u32 %s587_s8, 4  ;;  %s282_s25 = int_to_ptr.vmem [resolvable:$true] %s281_s25  ;;  %s284_s3 = int_to_ptr.hbm [resolvable:$true] %s283_s3 }
   0xe   :  { %77 = vmatpush.msra.mxu0 %v50_v6  ;;  %v323_v17 = vld [vmem:[%s585_s6] ss:$0 sm:$0xff]  ;;  %s298_s6 = sld [smem:[#allocation2 + $0x1]]  ;;  %v198_v38 = vstv %s299_s15  ;;  %s416_s28 = smov [#allocation5]  }
   0xf   :  { %302 = vmatmul.msk.f32.vlgmr.msra.gmra.mxu0 %vm58_vm0, %v48_v7  ;;  %110 = vmatpush.msra.mxu1 %v87_v8  ;;  %v517_v20 = vld [vmem:[%s581_s2] sm:$0xff]  ;;  %v201_v59 = vstv %s527_s17  ;;  %vm247_vm0 = vcmask 48128   ;;  %s270_s29 = sshll.u32 %s416_s28, 4  ;;  %s272_s9 = sshll.u32 %s586_s7, 4  ;;  %s271_s29 = int_to_ptr.vmem [resolvable:$true] %s270_s29  ;;  %s273_s9 = int_to_ptr.hbm [resolvable:$true] %s272_s9 }
  0x10   :  { %v185_v22 = vmul.f32 %v184_v21, %v517_v20  ;;  %vm544_vm7 = vcmp.eq.f32.partialorder %v517_v20, %v201_v59  ;;  %vm208_vm10 = vcmp.gt.f32.partialorder %v517_v20, 0.0 }
  0x11   :  { %111 = vmatpush.msra.mxu1 %v86_v9 }
  0x13   :  { %112 = vmatpush.msra.mxu1 %v85_v10 }
  0x14   :  { %s138_s2 = ssub.f32 1.0, %s298_s6  ;;  %s141_s16 = smul.f32 0.05, %s298_s6 }
  0x15   :  { %113 = vmatpush.msra.mxu1 %v84_v11 }
  0x16   :  { %v139_v34 = vstv %s138_s2  ;;  %v142_v41 = vstv %s141_s16 }
  0x17   :  { %114 = vmatpush.msra.mxu1 %v83_v12  ;;  %v191_v12 = vmul.f32 -0.5, %v517_v20 }
  0x8c   :  { %v79_v14 = vpop.f32.mrf.mxu0 }
  0x8d   :  { %v80_v15 = vadd.f32 %v322_v13, %v79_v14  ;;  %v192_v13 = vmul.f32 %v191_v12, %v517_v20  ;;  %v193_v14 = vstv %s301_s21 }
  0x8f   :  { %324 = vtanh.f32 %v80_v15  ;;  %v194_v15 = vsub.f32 %v192_v13, %v193_v14 }
  0x95   :  { %v325_v16 = vpop.eup %324 }
  0x96   :  { %303 = vmatmul.msk.f32.vlgmr.msra.gmra.mxu1 %vm95_vm1, %v325_v16  ;;  %vm249_vm1 = vcmask 56320  }
 0x113   :  { %v116_v18 = vpop.f32.mrf.mxu1 }
 0x114   :  { %v510_v19 = vadd.f32 %v323_v17, %v116_v18  ;;  %v411_v17 = vmov 0  }
 0x115   :  { %v203_v18 = vsel %vm544_vm7, 1, %v411_v17 }
 0x116   :  { %120 = vrot.lane.b32.xlu0 %v510_v19, %s407_s5  ;;  %326 = vtanh.f32 %v510_v19 }
 0x11c   :  { %v327_v27 = vpop.eup %326 }
 0x11e   :  { %187 = vrot.lane.b32.xlu0 %v185_v22, %s407_s5 }
 0x188   :  { %v121_v23 = vpop.permute.xlu0 %120 }
 0x189   :  { %v522_v24 = vsub.f32 %v510_v19, %v121_v23 }
 0x18b   :  { %v124_v25 = vmul.f32 0.5, %v522_v24  ;;  %v130_v26 = vand.u32 2147483647, %v522_v24  ;;  %v128_v3 = vsub.f32 0.0, %v522_v24 }
 0x18d   :  { %328 = vtanh.f32 %v124_v25  ;;  %v131_v31 = vsub.f32 0.0, %v130_v26  ;;  %v129_v8 = vmax.f32 %v128_v3, 0.0 }
 0x18f   :  { %v132_v37 = vmul.f32 1.442695, %v131_v31 }
 0x190   :  { %v188_v28 = vpop.permute.xlu0 %187 }
 0x191   :  { %v190_v29 = vadd.f32 %v327_v27, %v188_v28  ;;  %330 = vpow2.f32 %v132_v37  ;;  %v413_v28 = vmov 1.0  }
 0x193   :  { %v329_v30 = vpop.eup %328  ;;  %v305_v32 = vclamps-f32 %v190_v29, 1.0  ;;  %v209_v29 = vsel %vm208_vm10, 0.0, %v413_v28 }
 0x194   :  { %v126_v33 = vadd.f32 1.0, %v329_v30 }
 0x195   :  { %v197_v36 = vand.u32 2147483647, %v305_v32 }
 0x196   :  { %v127_v35 = vmul.f32 0.5, %v126_v33 }
 0x197   :  { %v199_v42 = vmul.f32 %v198_v38, %v197_v36  ;;  %v331_v49 = vpop.eup %330 }
 0x198   :  { %v144_v39 = vsub.f32 1.0, %v127_v35  ;;  %v140_v40 = vmul.f32 %v139_v34, %v127_v35  ;;  %v134_v52 = vadd.f32 1.0, %v331_v49 }
 0x199   :  { %v307_v46 = vceil.f32 %v199_v42  ;;  %v308_v47 = vfloor.f32 %v199_v42  ;;  %vm306_vm2 = vcmp.lt.s32.totalorder %v199_v42, 0 }
 0x19a   :  { %v145_v43 = vmul.f32 %v144_v39, %v139_v34  ;;  %v143_v45 = vadd.f32 %v142_v41, %v140_v40 }
 0x19b   :  { %v529_v50 = vsel %vm306_vm2, %v307_v46, %v308_v47  ;;  %vm251_vm2 = vcmask 64512  }
 0x19c   :  { %v146_v44 = vadd.f32 %v145_v43, %v142_v41  ;;  %v310_v54 = vcvt.f32.s32 %v529_v50 }
 0x19e   :  { %332 = vlog2.f32 %v146_v44  ;;  %v147_v48 = vadd.f32 %v146_v44, %v143_v45  ;;  %v210_v57 = vcvt.s32.f32 %v310_v54 }
 0x1a0   :  { %334 = vrcp.f32 %v147_v48  ;;  %v159_v60 = vand.u32 2147483648, %v147_v48  ;;  %v157_v62 = vand.u32 2147483647, %v147_v48  ;;  %v211_v63 = vadd.f32 %v210_v57, %v201_v59 }
 0x1a1   :  { %336 = vlog2.f32 %v134_v52  ;;  %vm153_vm4 = vweird.f32 %v147_v48 }
 0x1a2   :  { %v160_v2 = vor.u32 1.1754944e-38, %v159_v60  ;;  %vm158_vm6 = vcmp.eq.f32.partialorder %v157_v62, 8.507059e+37  ;;  %338 = vlog2.f32 %v143_v45 }
 0x1a4   :  { %v333_v51 = vpop.eup %332 }
 0x1a5   :  { %v173_v53 = vmul.f32 0.6931472, %v333_v51 }
 0x1a6   :  { %v335_v55 = vpop.eup %334 }
 0x1a7   :  { %179 = vrot.lane.b32.xlu2 %v173_v53, %s408_s18  ;;  %v149_v56 = vmul.f32 %v335_v55, %v147_v48  ;;  %vm154_vm3 = vweird.f32 %v335_v55  ;;  %v337_v1 = vpop.eup %336 }
 0x1a8   :  { %vm155_vm5 = vmor %vm153_vm4, %vm154_vm3  ;;  %v136_v7 = vmul.f32 0.6931472, %v337_v1  ;;  %v339_v10 = vpop.eup %338 }
 0x1a9   :  { %v150_v58 = vsub.f32 1.0, %v149_v56  ;;  %v171_v11 = vmul.f32 0.6931472, %v339_v10 }
 0x1aa   :  { %v137_v9 = vadd.f32 %v136_v7, %v129_v8 }
 0x1ab   :  { %v151_v61 = vmul.f32 %v335_v55, %v150_v58 }
 0x1ad   :  { %v152_v0 = vadd.f32 %v335_v55, %v151_v61 }
 0x1af   :  { %213 = vrot.lane.b32.xlu2 %v211_v63, %s409_s19  ;;  %v156_v4 = vsel %vm155_vm5, %v335_v55, %v152_v0 }
 0x1b0   :  { %v161_v5 = vsel %vm158_vm6, %v160_v2, %v156_v4 }
 0x1b1   :  { %v162_v6 = vmul.f32 %v161_v5, %v143_v45 }
 0x1b3   :  { %164 = vrot.lane.b32.xlu1 %v162_v6, %s408_s18 }
 0x1b7   :  { %222 = vrot.lane.b32.xlu2 %v137_v9, %s410_s20 }
 0x1bb   :  { %175 = vrot.lane.b32.xlu1 %v171_v11, %s408_s18 }
 0x1bf   :  { %255 = vrot.lane.b32.xlu2 %v203_v18, %s412_s22 }
 0x1c3   :  { %226 = vrot.lane.b32.xlu1 %v194_v15, %s407_s5 }
 0x201   :  { %v180_v23 = vpop.permute.xlu2 %179 }
 0x209   :  { %v214_v27 = vpop.permute.xlu2 %213 }
 0x20a   :  { %v216_v30 = vsel %vm544_vm7, %v214_v27, %v517_v20 }
 0x211   :  { %v223_v33 = vpop.permute.xlu2 %222 }
 0x219   :  { %v256_v38 = vpop.permute.xlu2 %255 }
 0x225   :  { %v165_v21 = vpop.permute.xlu1 %164 }
 0x226   :  { %vm167_vm8 = vcmp.ge.f32.partialorder %v517_v20, %v165_v21 }
 0x227   :  { %v168_v22 = vsel %vm167_vm8, 1, %v411_v17  ;;  %vm304_vm9 = vmneg %vm167_vm8 }
 0x228   :  { %253 = vrot.lane.b32.xlu0 %v168_v22, %s407_s5  ;;  %v204_v26 = vsel %vm304_vm9, 1, %v411_v17 }
 0x22d   :  { %v176_v24 = vpop.permute.xlu1 %175 }
 0x22e   :  { %v182_v25 = vsel %vm304_vm9, %v176_v24, %v180_v23 }
 0x22f   :  { %218 = vrot.lane.b32.xlu1 %v182_v25, %s409_s19 }
 0x230   :  { %205 = vrot.lane.b32.xlu0 %v204_v26, %s409_s19 }
 0x235   :  { %v227_v31 = vpop.permute.xlu1 %226 }
 0x237   :  { %234 = vrot.lane.b32.xlu1 %v216_v30, %s414_s23 }
 0x238   :  { %230 = vrot.lane.b32.xlu0 %v209_v29, %s412_s22 }
 0x29a   :  { %v254_v32 = vpop.permute.xlu0 %253 }
 0x2a1   :  { %v219_v34 = vpop.permute.xlu1 %218 }
 0x2a2   :  { %v206_v35 = vpop.permute.xlu0 %205  ;;  %v238_v37 = vsel %vm237_vm11, %v219_v34, %v223_v33 }
 0x2a3   :  { %v207_v36 = vmul.u32 %v206_v35, %v203_v18  ;;  %v240_v40 = vsel %vm239_vm12, %v238_v37, %v227_v31 }
 0x2a4   :  { %v242_v45 = vsel %vm241_vm14, %v240_v40, %v510_v19 }
 0x2a5   :  { %v257_v39 = vsel %vm237_vm11, %v207_v36, %v254_v32 }
 0x2a6   :  { %v258_v20 = vsel %vm239_vm12, %v257_v39, %v310_v54 }
 0x2a7   :  { %v259_v41 = vsel %vm241_vm14, %v258_v20, %v256_v38 }
 0x2a8   :  { %v260_v42 = vsel %vm243_vm13, %v259_v41, 0 }
 0x2a9   :  { %v261_v43 = vsel %vm245_vm15, %v260_v42, 0  ;;  %v235_v47 = vpop.permute.xlu1 %234 }
 0x2aa   :  { %v231_v44 = vpop.permute.xlu0 %230  ;;  %v262_v46 = vsel %vm247_vm0, %v261_v43, 0 }
 0x2ab   :  { %v244_v48 = vsel %vm243_vm13, %v242_v45, %v231_v44  ;;  %v263_v49 = vsel %vm249_vm1, %v262_v46, 0 }
 0x2ac   :  { %v246_v50 = vsel %vm245_vm15, %v244_v48, %v235_v47  ;;  %264 = vst.msk [vmem:[#allocation6] sm:$0xff] %vm251_vm2, %v263_v49 }
 0x2ad   :  { %v248_v51 = vsel %vm247_vm0, %v246_v50, 0.0  ;;  %286 = dma.vmem_to_hbm [thread:$0]  %s282_s25, 128, %s284_s3, [#allocation7]  }
 0x2ae   :  { %v250_v19 = vsel %vm249_vm1, %v248_v51, 0.0 }
 0x2af   :  { %252 = vst.msk [vmem:[#allocation5] sm:$0xff] %vm251_vm2, %v250_v19 }
 0x2b0   :  { %275 = dma.vmem_to_hbm [thread:$0]  %s271_s29, 128, %s273_s9, [#allocation3]  }
 0x2b1   :  { %402 = dma.done.wait [#allocation3], 128  }
 0x2b2   :  { %403 = vsyncadd [#allocation3], 4294967168 }
 0x2b3   :  { %404 = dma.done.wait [#allocation7], 128  }
 0x2b4   :  { %405 = vsyncadd [#allocation7], 4294967168 }
 0x2b5   :  { %295 = vsyncpa [#allocation3], 1 }
 0x2b6   :  { %296 = vsyncpa [#allocation7], 1 }
 0x2b7   :  { %297 = vsyncpa [#allocation4], 1 }

</bundles_post_ra>
